<compile_context>
chip_gen: v6e
topology: v6e:2x2x1
jax: 0.10.0
libtpu: 0.0.40
codegen_flags: <defaults>
</compile_context>

<pallas_src>
import jax
import jax.numpy as jnp
from jax.experimental import pallas as pl
from jax.experimental.pallas import tpu as pltpu


def _round_up(x, m):
    return ((x + m - 1) // m) * m


def _make_gcn_kernel(apply_w, x_resident, tk):
    """Builds the kernel body for the chosen variant."""

    def kernel(*refs):
        if apply_w:
            adj_ref, x_ref, w_ref, b_ref, o_ref, acc_ref = refs
        else:
            adj_ref, x_ref, b_ref, o_ref, acc_ref = refs
            w_ref = None

        k = pl.program_id(1)

        @pl.when(k == 0)
        def _init():
            acc_ref[...] = jnp.zeros_like(acc_ref)

        if x_resident:
            # Full feature matrix lives in VMEM; slice the current k-chunk.
            start = pl.multiple_of(k * tk, tk)
            x_tile = x_ref[pl.ds(start, tk), :]
        else:
            x_tile = x_ref[...]

        # Message passing (sum over in-edges): bf16 MXU matmul, f32 accumulate.
        acc_ref[...] += jnp.dot(adj_ref[...], x_tile,
                                preferred_element_type=jnp.float32)

        @pl.when(k == pl.num_programs(1) - 1)
        def _finish():
            acc = acc_ref[...]
            if apply_w:
                # Node-apply Linear, hoisted out of the reduction loop.
                y = jnp.dot(acc.astype(jnp.bfloat16), w_ref[...],
                            preferred_element_type=jnp.float32) + b_ref[...]
            else:
                # XW was precomputed in the wrapper; only bias + ReLU remain.
                y = acc + b_ref[...]
            o_ref[...] = jnp.maximum(y, 0.0).astype(o_ref.dtype)

    return kernel


def gcn_forward(adj, x, w, b, *, tm=None, tk=None, force_stream_x=False):
    """adj: (N, N) dense 0/1, x: (N, in), w: (out, in) [nn.Linear], b: (out,)."""
    n, f_in = x.shape
    f_out = w.shape[0]

    f_in_p = _round_up(f_in, 128)
    f_out_p = _round_up(f_out, 128)

    # Tile sizes: big enough to amortize the ~0.35us/step overhead and feed the
    # 256x256 MXU, small enough for v7x's 64 MiB VMEM, and (when the graph is
    # big enough) >= 2 row tiles so the "parallel" axis shards across both v7x
    # TensorCores.
    n128 = _round_up(n, 128)
    if tm is None:
        tm = 128 if n128 <= 256 else min(512, _round_up(n128 // 2, 128))
    if tk is None:
        tk = min(512, n128)
    n_pad_r = _round_up(n, tm)   # destination-node (row) padding
    n_pad_c = _round_up(n, tk)   # source-node (col) padding

    # If out_feats is narrower than in_feats (after padding), contract the
    # feature dim once up front (XW = X @ W^T) so the O(N^2) matmul runs with
    # the smaller inner dimension and the epilogue is just bias + ReLU.
    apply_w = f_out_p >= f_in_p
    if apply_w:
        feat = x.astype(jnp.float32)
        f_feat = f_in_p
    else:
        feat = x.astype(jnp.float32) @ w.astype(jnp.float32).T
        f_feat = f_out_p

    # bf16 operands (0/1 adjacency is exact in bf16); accumulation stays f32.
    adj_p = jnp.pad(adj.astype(jnp.bfloat16),
                    ((0, n_pad_r - n), (0, n_pad_c - n)))
    feat_p = jnp.pad(feat.astype(jnp.bfloat16),
                     ((0, n_pad_c - n), (0, f_feat - feat.shape[1])))
    b_p = jnp.pad(b.astype(jnp.float32), (0, f_out_p - f_out)).reshape(1, f_out_p)

    grid = (n_pad_r // tm, n_pad_c // tk)

    # Keep the feature matrix VMEM-resident when small so it is not re-DMA'd
    # once per row tile.
    x_resident = (not force_stream_x) and (n_pad_c * f_feat * 2 <= 4 * 1024 * 1024)

    in_specs = [pl.BlockSpec((tm, tk), lambda i, k: (i, k))]           # A tile
    operands = [adj_p]
    if x_resident:
        in_specs.append(pl.BlockSpec((n_pad_c, f_feat), lambda i, k: (0, 0)))
    else:
        in_specs.append(pl.BlockSpec((tk, f_feat), lambda i, k: (k, 0)))
    operands.append(feat_p)
    if apply_w:
        # Pre-transposed bf16 weight: (in_feats_p, out_feats_p), lane-dense.
        # TODO(synk): tile f_out with a third grid axis if f_in_p*f_out_p ever
        # grows large enough to pressure the 64 MiB v7x VMEM.
        w_p = jnp.pad(w.astype(jnp.bfloat16).T,
                      ((0, f_in_p - f_in), (0, f_out_p - f_out)))
        in_specs.append(pl.BlockSpec((f_in_p, f_out_p), lambda i, k: (0, 0)))
        operands.append(w_p)
    in_specs.append(pl.BlockSpec((1, f_out_p), lambda i, k: (0, 0)))   # bias
    operands.append(b_p)

    flops = 2 * n_pad_r * n_pad_c * f_feat
    if apply_w:
        flops += 2 * n_pad_r * f_in_p * f_out_p
    feat_bytes = n_pad_c * f_feat * 2
    bytes_accessed = (n_pad_r * n_pad_c * 2
                      + (feat_bytes if x_resident else feat_bytes * grid[0])
                      + (f_in_p * f_out_p * 2 if apply_w else 0)
                      + f_out_p * 4
                      + n_pad_r * f_out_p * 2)

    kernel = _make_gcn_kernel(apply_w, x_resident, tk)

    out_p = pl.pallas_call(
        kernel,
        out_shape=jax.ShapeDtypeStruct((n_pad_r, f_out_p), jnp.bfloat16),
        grid_spec=pltpu.PrefetchScalarGridSpec(
            num_scalar_prefetch=0,
            grid=grid,
            in_specs=in_specs,
            out_specs=pl.BlockSpec((tm, f_out_p), lambda i, k: (i, 0)),
            scratch_shapes=[pltpu.VMEM((tm, f_feat), jnp.float32)],
        ),
        compiler_params=pltpu.CompilerParams(
            dimension_semantics=("parallel", "arbitrary"),
            # 48 MiB fits v7x's 64 MiB/TC with headroom for Mosaic internal
            # scratch; for these tile sizes it is never binding on v6e/v5e.
            vmem_limit_bytes=48 * 1024 * 1024,
        ),
        cost_estimate=pl.CostEstimate(
            flops=flops, transcendentals=0, bytes_accessed=bytes_accessed),
    )(*operands)

    return out_p[:n, :f_out].astype(jnp.float32)


if __name__ == "__main__":
    def make_inputs(key, n, f_in, f_out):
        k_adj, k_x, k_w, k_b = jax.random.split(key, 4)
        adj = (jax.random.uniform(k_adj, (n, n)) < 0.3).astype(jnp.float32)
        x = jax.random.normal(k_x, (n, f_in), dtype=jnp.float32)
        bound = 1.0 / (f_in ** 0.5)
        w = jax.random.uniform(k_w, (f_out, f_in), minval=-bound, maxval=bound)
        b = jax.random.uniform(k_b, (f_out,), minval=-bound, maxval=bound)
        return adj, x, w, b

    def reference(adj, x, w, b):
        # Pure-JAX reference; X rounded to bf16 (matching the kernel's input
        # cast), everything else f32.
        x_bf = x.astype(jnp.bfloat16).astype(jnp.float32)
        return jnp.maximum((adj @ x_bf) @ w.T + b[None, :], 0.0)

    key = jax.random.PRNGKey(0)
    k1, k2, k3 = jax.random.split(key, 3)

    cases = [
        # (name, inputs, kwargs, atol, rtol)
        ("apply-W epilogue path",
         make_inputs(k1, 16, 8, 32), {}, 5e-2, 5e-2),
        ("precomputed-XW path (f_out_p < f_in_p)",
         make_inputs(k2, 24, 200, 32), {}, 5e-2, 5e-2),
        # 3x3 grid of 128-tiles: exercises the multi-step k-reduction,
        # accumulator init/finish and the streamed-X BlockSpec. Larger
        # in-degree (~90) => larger magnitudes under bf16 => looser atol.
        ("multi-tile / streamed-X path",
         make_inputs(k3, 300, 64, 64),
         dict(tm=128, tk=128, force_stream_x=True), 1.5e-1, 5e-2),
    ]

    for name, (adj, x, w, b), kwargs, atol, rtol in cases:
        out = gcn_forward(adj, x, w, b, **kwargs)
        jax.block_until_ready(out)
        ref = reference(adj, x, w, b)
        assert out.shape == ref.shape, (name, out.shape, ref.shape)
        max_err = float(jnp.max(jnp.abs(out - ref)))
        assert jnp.allclose(out, ref, atol=atol, rtol=rtol), (name, max_err)

    print("KERNEL_OK")
</pallas_src>

<mosaic_0001>
module attributes {stable_mosaic.version = 11 : i64} {
  func.func @kernel(%arg0: i32, %arg1: i32, %arg2: memref<128x128xbf16, #tpu.memory_space<vmem>>, %arg3: memref<128x128xbf16, #tpu.memory_space<vmem>>, %arg4: memref<128x128xbf16, #tpu.memory_space<vmem>>, %arg5: memref<1x128xf32, #tpu.memory_space<vmem>>, %arg6: memref<128x128xbf16, #tpu.memory_space<vmem>>, %arg7: memref<128x128xf32, #tpu.memory_space<vmem>>) attributes {dimension_semantics = [#tpu.dimension_semantics<parallel>, #tpu.dimension_semantics<arbitrary>], iteration_bounds = array<i64: 1, 1>, scalar_prefetch = 0 : i64, scratch_operands = 1 : i64, tpu.core_type = #tpu.core_type<tc>, window_params = [{transform_indices = @transform_0, window_bounds = array<i64: 128, 128>}, {pipeline_mode = #tpu.pipeline_mode<synchronous>, transform_indices = @transform_1, window_bounds = array<i64: 128, 128>}, {pipeline_mode = #tpu.pipeline_mode<synchronous>, transform_indices = @transform_2, window_bounds = array<i64: 128, 128>}, {pipeline_mode = #tpu.pipeline_mode<synchronous>, transform_indices = @transform_3, window_bounds = array<i64: 1, 128>}, {transform_indices = @transform_4, window_bounds = array<i64: 128, 128>}]} {
    %c0_i32 = arith.constant 0 : i32
    %0 = arith.cmpi eq, %arg1, %c0_i32 : i32
    %1 = arith.extui %0 : i1 to i32
    %c0_i32_0 = arith.constant 0 : i32
    %2 = arith.cmpi ne, %1, %c0_i32_0 : i32
    scf.if %2 {
      %cst_9 = arith.constant 0.000000e+00 : f32
      %15 = vector.broadcast %cst_9 : f32 to vector<128x128xf32>
      %c0_10 = arith.constant 0 : index
      %c0_11 = arith.constant 0 : index
      %16 = vector.load %arg7[%c0_10, %c0_11] : memref<128x128xf32, #tpu.memory_space<vmem>>, vector<128x128xf32>
      tpu.vector_store %arg7[%c0_10, %c0_11], %15 {strides = array<i32>} : memref<128x128xf32, #tpu.memory_space<vmem>>, vector<128x128xf32>,
    } else {
    }
    %c128_i32 = arith.constant 128 : i32
    %3 = arith.muli %arg1, %c128_i32 : i32
    %4 = tpu.assume_multiple %3, 128 : i32
    %5 = arith.index_cast %4 : i32 to index
    %c0 = arith.constant 0 : index
    %6 = vector.load %arg3[%5, %c0] : memref<128x128xbf16, #tpu.memory_space<vmem>>, vector<128x128xbf16>
    %c0_1 = arith.constant 0 : index
    %c0_2 = arith.constant 0 : index
    %7 = vector.load %arg7[%c0_1, %c0_2] : memref<128x128xf32, #tpu.memory_space<vmem>>, vector<128x128xf32>
    %c0_3 = arith.constant 0 : index
    %c0_4 = arith.constant 0 : index
    %8 = vector.load %arg2[%c0_3, %c0_4] : memref<128x128xbf16, #tpu.memory_space<vmem>>, vector<128x128xbf16>
    %cst = arith.constant dense<0.000000e+00> : vector<128x128xf32>
    %9 = tpu.matmul %8, %6, %cst {dimension_numbers = #tpu.dot_dimension_numbers<[1], [0], [0], [1], [0, 0, 1, 1], [], []>} : vector<128x128xbf16>, vector<128x128xbf16>, vector<128x128xf32> -> vector<128x128xf32>
    %10 = arith.addf %7, %9 : vector<128x128xf32>
    %c0_5 = arith.constant 0 : index
    %c0_6 = arith.constant 0 : index
    %11 = vector.load %arg7[%c0_5, %c0_6] : memref<128x128xf32, #tpu.memory_space<vmem>>, vector<128x128xf32>
    tpu.vector_store %arg7[%c0_5, %c0_6], %10 {strides = array<i32>} : memref<128x128xf32, #tpu.memory_space<vmem>>, vector<128x128xf32>,
    %c0_i32_7 = arith.constant 0 : i32
    %12 = arith.cmpi eq, %arg1, %c0_i32_7 : i32
    %13 = arith.extui %12 : i1 to i32
    %c0_i32_8 = arith.constant 0 : i32
    %14 = arith.cmpi ne, %13, %c0_i32_8 : i32
    scf.if %14 {
      %c0_9 = arith.constant 0 : index
      %c0_10 = arith.constant 0 : index
      %15 = vector.load %arg7[%c0_9, %c0_10] : memref<128x128xf32, #tpu.memory_space<vmem>>, vector<128x128xf32>
      %16 = arith.truncf %15 : vector<128x128xf32> to vector<128x128xbf16>
      %c0_11 = arith.constant 0 : index
      %c0_12 = arith.constant 0 : index
      %17 = vector.load %arg4[%c0_11, %c0_12] : memref<128x128xbf16, #tpu.memory_space<vmem>>, vector<128x128xbf16>
      %cst_13 = arith.constant dense<0.000000e+00> : vector<128x128xf32>
      %18 = tpu.matmul %16, %17, %cst_13 {dimension_numbers = #tpu.dot_dimension_numbers<[1], [0], [0], [1], [0, 0, 1, 1], [], []>} : vector<128x128xbf16>, vector<128x128xbf16>, vector<128x128xf32> -> vector<128x128xf32>
      %c0_14 = arith.constant 0 : index
      %c0_15 = arith.constant 0 : index
      %19 = vector.load %arg5[%c0_14, %c0_15] : memref<1x128xf32, #tpu.memory_space<vmem>>, vector<1x128xf32>
      %20 = vector.broadcast %19 : vector<1x128xf32> to vector<128x128xf32>
      %21 = arith.addf %18, %20 : vector<128x128xf32>
      %cst_16 = arith.constant 0.000000e+00 : f32
      %22 = vector.broadcast %cst_16 : f32 to vector<128x128xf32>
      %23 = arith.maximumf %21, %22 : vector<128x128xf32>
      %24 = arith.truncf %23 : vector<128x128xf32> to vector<128x128xbf16>
      %c0_17 = arith.constant 0 : index
      %c0_18 = arith.constant 0 : index
      %25 = vector.load %arg6[%c0_17, %c0_18] : memref<128x128xbf16, #tpu.memory_space<vmem>>, vector<128x128xbf16>
      tpu.vector_store %arg6[%c0_17, %c0_18], %24 {strides = array<i32>} : memref<128x128xbf16, #tpu.memory_space<vmem>>, vector<128x128xbf16>,
    } else {
    }
    return
  }
  func.func @transform_0(%arg0: i32, %arg1: i32) -> (i32, i32) {
    %c0_i32 = arith.constant 0 : i32
    return %arg0, %arg1 : i32, i32
  }
  func.func @transform_1(%arg0: i32, %arg1: i32) -> (i32, i32) {
    %c0_i32 = arith.constant 0 : i32
    %c0_i32_0 = arith.constant 0 : i32
    %c0_i32_1 = arith.constant 0 : i32
    return %c0_i32, %c0_i32_0 : i32, i32
  }
  func.func @transform_2(%arg0: i32, %arg1: i32) -> (i32, i32) {
    %c0_i32 = arith.constant 0 : i32
    %c0_i32_0 = arith.constant 0 : i32
    %c0_i32_1 = arith.constant 0 : i32
    return %c0_i32, %c0_i32_0 : i32, i32
  }
  func.func @transform_3(%arg0: i32, %arg1: i32) -> (i32, i32) {
    %c0_i32 = arith.constant 0 : i32
    %c0_i32_0 = arith.constant 0 : i32
    %c0_i32_1 = arith.constant 0 : i32
    return %c0_i32, %c0_i32_0 : i32, i32
  }
  func.func @transform_4(%arg0: i32, %arg1: i32) -> (i32, i32) {
    %c0_i32 = arith.constant 0 : i32
    %c0_i32_0 = arith.constant 0 : i32
    return %arg0, %c0_i32 : i32, i32
  }
}

</mosaic_0001>

<bundles_post_ra>
// kernel: tpu_custom_call.1
= control target key start
LH: loop header
LB: loop body
LE: loop exit
PB: predicated region body
PF: predicated region fallthrough
CT: control target
= control target key end

     0   :  { %9 = vsyncpa [#allocation4], 0  ;;  %s1043_s0 = inlined_call_operand.hbm [shape: bf16[128,128], index: 0, kind: input, shape index: {}]   ;;  %s1044_s1 = inlined_call_operand.hbm [shape: bf16[128,128], index: 1, kind: input, shape index: {}]   ;;  %s1045_s2 = inlined_call_operand.hbm [shape: bf16[128,128], index: 2, kind: input, shape index: {}]   ;;  %s1046_s3 = inlined_call_operand.vmem [shape: f32[1,128], index: 3, kind: input, shape index: {}]   ;;  %s1047_s4 = inlined_call_operand.hbm [shape: bf16[128,128], index: 4, kind: output, shape index: {}]  }
   0x1   :  { %10 = vsyncpa [#allocation7], 0 }
   0x2   :  { %11 = vsyncpa [#allocation5], 0  ;;  %s985_s15 = smov [#allocation6]   ;;  %s986_s17 = smov [#allocation3]  }
   0x3   :  { %s29_s16 = sshll.u32 %s985_s15, 4  ;;  %s17_s18 = sshll.u32 %s986_s17, 4  ;;  %s30_s16 = int_to_ptr.vmem [resolvable:$true] %s29_s16  ;;  %s18_s18 = int_to_ptr.vmem [resolvable:$true] %s17_s18 }
   0x4   :  { %s907_s19 = scalar_lea.vmem %s30_s16, 1024  ;;  %p912_p1 = scmp.lt.s32.totalorder %s30_s16, %s30_s16 }
   0x5   :  { %p908_p0 = scmp.ne.s32.totalorder %s30_s16, %s907_s19  ;;  %p913_p2 = scmp.lt.s32.totalorder %s907_s19, %s907_s19 }
   0x7   :  { %p914_p3 = por %p913_p2, %p912_p1 }
   0x9   :  { %p915_p4 = pnand %p914_p3, %p908_p0 }
   0xb   :  { %918 = shalt.err (!%p915_p4)
}
   0xc   :  { %s987_s20 = smov 64   ;;  %s988_s21 = smov 4  }
   0xd   :  { %35 = dma.hbm_to_vmem [thread:$0]  %s1044_s1, 1024, %s30_s16, [#allocation7], %s987_s20, %s987_s20, %s988_s21  }
   0xe   :  { %s927_s24 = scalar_lea.vmem %s18_s18, 1024  ;;  %p932_p6 = scmp.lt.s32.totalorder %s18_s18, %s18_s18 }
   0xf   :  { %p928_p5 = scmp.ne.s32.totalorder %s18_s18, %s927_s24  ;;  %p933_p7 = scmp.lt.s32.totalorder %s927_s24, %s927_s24 }
  0x11   :  { %p934_p8 = por %p933_p7, %p932_p6 }
  0x13   :  { %p935_p9 = pnand %p934_p8, %p928_p5 }
  0x15   :  { %938 = shalt.err (!%p935_p9)
}
  0x16   :  { %23 = dma.hbm_to_vmem [thread:$0]  %s1043_s0, 1024, %s18_s18, [#allocation4], %s987_s20, %s987_s20, %s988_s21  }
  0x17   :  { %s989_s27 = smov [#allocation8]  }
  0x18   :  { %s41_s28 = sshll.u32 %s989_s27, 4  ;;  %s42_s28 = int_to_ptr.vmem [resolvable:$true] %s41_s28 }
  0x19   :  { %s947_s29 = scalar_lea.vmem %s42_s28, 1024  ;;  %p952_p11 = scmp.lt.s32.totalorder %s42_s28, %s42_s28 }
  0x1a   :  { %p948_p10 = scmp.ne.s32.totalorder %s42_s28, %s947_s29  ;;  %p953_p12 = scmp.lt.s32.totalorder %s947_s29, %s947_s29 }
  0x1c   :  { %p954_p13 = por %p953_p12, %p952_p11 }
  0x1e   :  { %p955_p0 = pnand %p954_p13, %p948_p10 }
  0x20   :  { %958 = shalt.err (!%p955_p0)
}
  0x21   :  { %47 = dma.hbm_to_vmem [thread:$0]  %s1045_s2, 1024, %s42_s28, [#allocation7], %s987_s20, %s987_s20, %s988_s21  }
  0x22   :  { %979 = dma.done.wait [#allocation4], 1024  }
  0x23   :  { %980 = vsyncadd [#allocation4], 4294966272 }
  0x24   :  { %981 = dma.done.wait [#allocation7], 2048  }
  0x25   :  { %982 = vsyncadd [#allocation7], 4294965248  ;;  %v875_v0 = vld [vmem:[#allocation6 + $0x38] sm:$0xff]   ;;  %v876_v1 = vld [vmem:[#allocation6 + $0x30] sm:$0xff]  }
  0x26   :  { %805 = vmatprep.subr.bf16.mxu0 %v875_v0  ;;  %v877_v2 = vld [vmem:[#allocation6 + $0x28] sm:$0xff]   ;;  %v878_v3 = vld [vmem:[#allocation6 + $0x20] sm:$0xff]   ;;  %v879_v5 = vld [vmem:[#allocation6 + $0x18] sm:$0xff]  }
  0x27   :  { %806 = vmatpush3.bf16.msra.mxu0 %v875_v0  ;;  %v883_v4 = vld [vmem:[#allocation3] sm:$0xff]   ;;  %v880_v6 = vld [vmem:[#allocation6 + $0x10] sm:$0xff]   ;;  %v891_v7 = vld [vmem:[#allocation8 + $0x38] sm:$0xff]  }
  0x28   :  { %807 = vmatprep.subr.bf16.mxu0 %v876_v1  ;;  %821 = vmatprep.mubr.bf16.mxu0 %v883_v4  ;;  %v892_v8 = vld [vmem:[#allocation8 + $0x30] sm:$0xff]   ;;  %v881_v9 = vld [vmem:[#allocation6 + $0x8] sm:$0xff]   ;;  %v882_v11 = vld [vmem:[#allocation6] sm:$0xff]  }
  0x29   :  { %837 = vmatprep.subr.bf16.mxu1 %v891_v7  ;;  %v893_v10 = vld [vmem:[#allocation8 + $0x28] sm:$0xff]   ;;  %v894_v12 = vld [vmem:[#allocation8 + $0x20] sm:$0xff]   ;;  %v895_v13 = vld [vmem:[#allocation8 + $0x18] sm:$0xff]  }
  0x2a   :  { %838 = vmatpush3.bf16.msra.mxu1 %v891_v7  ;;  %v884_v14 = vld [vmem:[#allocation3 + $0x8] sm:$0xff]   ;;  %v885_v15 = vld [vmem:[#allocation3 + $0x10] sm:$0xff]   ;;  %v886_v17 = vld [vmem:[#allocation3 + $0x18] sm:$0xff]  }
  0x2b   :  { %808 = vmatpush3.bf16.msra.mxu0 %v876_v1  ;;  %839 = vmatprep.subr.bf16.mxu1 %v892_v8  ;;  %v896_v16 = vld [vmem:[#allocation8 + $0x10] sm:$0xff]   ;;  %v887_v18 = vld [vmem:[#allocation3 + $0x20] sm:$0xff]   ;;  %v888_v19 = vld [vmem:[#allocation3 + $0x28] sm:$0xff]  }
  0x2c   :  { %809 = vmatprep.subr.bf16.mxu0 %v877_v2  ;;  %v889_v20 = vld [vmem:[#allocation3 + $0x30] sm:$0xff]   ;;  %v890_v21 = vld [vmem:[#allocation3 + $0x38] sm:$0xff]   ;;  %v897_v22 = vld [vmem:[#allocation8 + $0x8] sm:$0xff]  }
  0x2d   :  { %v898_v23 = vld [vmem:[#allocation8] sm:$0xff]  }
  0x2e   :  { %840 = vmatpush3.bf16.msra.mxu1 %v892_v8  ;;  %v685_v49 = vld [vmem:[%s1046_s3] ss:$0 sm:$0xff]  ;;  %s990_s3 = smov [#allocation9]  }
  0x2f   :  { %810 = vmatpush3.bf16.msra.mxu0 %v877_v2  ;;  %841 = vmatprep.subr.bf16.mxu1 %v893_v10  ;;  %s654_s5 = sshll.u32 %s990_s3, 4  ;;  %s655_s5 = int_to_ptr.vmem [resolvable:$true] %s654_s5 }
  0x30   :  { %811 = vmatprep.subr.bf16.mxu0 %v878_v3  ;;  %s959_s6 = scalar_lea.vmem %s655_s5, 1024  ;;  %p964_p2 = scmp.lt.s32.totalorder %s655_s5, %s655_s5 }
  0x31   :  { %p960_p1 = scmp.ne.s32.totalorder %s655_s5, %s959_s6  ;;  %p965_p3 = scmp.lt.s32.totalorder %s959_s6, %s959_s6 }
  0x32   :  { %842 = vmatpush3.bf16.msra.mxu1 %v893_v10 }
  0x33   :  { %812 = vmatpush3.bf16.msra.mxu0 %v878_v3  ;;  %843 = vmatprep.subr.bf16.mxu1 %v894_v12  ;;  %p966_p4 = por %p965_p3, %p964_p2 }
  0x34   :  { %813 = vmatprep.subr.bf16.mxu0 %v879_v5 }
  0x35   :  { %p967_p5 = pnand %p966_p4, %p960_p1 }
  0x36   :  { %844 = vmatpush3.bf16.msra.mxu1 %v894_v12 }
  0x37   :  { %814 = vmatpush3.bf16.msra.mxu0 %v879_v5  ;;  %845 = vmatprep.subr.bf16.mxu1 %v895_v13 }
  0x38   :  { %815 = vmatprep.subr.bf16.mxu0 %v880_v6 }
  0x3a   :  { %846 = vmatpush3.bf16.msra.mxu1 %v895_v13 }
  0x3b   :  { %816 = vmatpush3.bf16.msra.mxu0 %v880_v6  ;;  %847 = vmatprep.subr.bf16.mxu1 %v896_v16 }
  0x3c   :  { %817 = vmatprep.subr.bf16.mxu0 %v881_v9 }
  0x3e   :  { %848 = vmatpush3.bf16.msra.mxu1 %v896_v16 }
  0x3f   :  { %818 = vmatpush3.bf16.msra.mxu0 %v881_v9  ;;  %849 = vmatprep.subr.bf16.mxu1 %v897_v22 }
  0x40   :  { %819 = vmatprep.subr.bf16.mxu0 %v882_v11 }
  0x42   :  { %850 = vmatpush3.bf16.msra.mxu1 %v897_v22 }
  0x43   :  { %820 = vmatpush3.bf16.msra.mxu0 %v882_v11  ;;  %851 = vmatprep.subr.bf16.mxu1 %v898_v23 }
  0x46   :  { %822 = vmatmul.mubr.bf16.vlgmr.msra.gmra.mxu0 %v884_v14  ;;  %852 = vmatpush3.bf16.msra.mxu1 %v898_v23 }
  0x47   :  { %825 = vmatprep.mubr.bf16.mxu0 %v885_v15 }
  0x4e   :  { %826 = vmatmul.mubr.bf16.gmra.mxu0 %v886_v17 }
  0x4f   :  { %829 = vmatprep.mubr.bf16.mxu0 %v887_v18 }
  0x56   :  { %830 = vmatmul.mubr.bf16.gmra.mxu0 %v888_v19 }
  0x57   :  { %833 = vmatprep.mubr.bf16.mxu0 %v889_v20 }
  0x5e   :  { %834 = vmatmul.mubr.bf16.gmra.mxu0 %v890_v21 }
 0x106   :  { %v823_v24 = vpop.f32.mrf.mxu0 }
 0x108   :  { %v263_v25 = vpop.f32.mrf.mxu0 }
 0x10a   :  { %v824_v26 = vpop.f32.mrf.mxu0 }
 0x10b   :  { %v378_v29 = vpack.c.bf16 %v824_v26, %v823_v24 }
 0x10c   :  { %v266_v27 = vpop.f32.mrf.mxu0 }
 0x10d   :  { %v377_v28 = vpack.c.bf16 %v266_v27, %v263_v25 }
 0x10e   :  { %v827_v30 = vpop.f32.mrf.mxu0 }
 0x10f   :  { %853 = vmatprep.mubr.bf16.mxu1 %v377_v28 }
 0x110   :  { %v279_v31 = vpop.f32.mrf.mxu0  ;;  %854 = vmatmul.mubr.bf16.vlgmr.msra.gmra.mxu1 %v378_v29 }
 0x112   :  { %v828_v32 = vpop.f32.mrf.mxu0 }
 0x113   :  { %v380_v35 = vpack.c.bf16 %v828_v32, %v827_v30 }
 0x114   :  { %v282_v33 = vpop.f32.mrf.mxu0 }
 0x115   :  { %v379_v34 = vpack.c.bf16 %v282_v33, %v279_v31 }
 0x116   :  { %v831_v36 = vpop.f32.mrf.mxu0 }
 0x117   :  { %857 = vmatprep.mubr.bf16.mxu1 %v379_v34 }
 0x118   :  { %v295_v37 = vpop.f32.mrf.mxu0  ;;  %858 = vmatmul.mubr.bf16.gmra.mxu1 %v380_v35 }
 0x11a   :  { %v832_v38 = vpop.f32.mrf.mxu0 }
 0x11b   :  { %v382_v41 = vpack.c.bf16 %v832_v38, %v831_v36 }
 0x11c   :  { %v298_v39 = vpop.f32.mrf.mxu0 }
 0x11d   :  { %v381_v40 = vpack.c.bf16 %v298_v39, %v295_v37 }
 0x11e   :  { %v835_v42 = vpop.f32.mrf.mxu0 }
 0x11f   :  { %861 = vmatprep.mubr.bf16.mxu1 %v381_v40 }
 0x120   :  { %v311_v43 = vpop.f32.mrf.mxu0  ;;  %862 = vmatmul.mubr.bf16.gmra.mxu1 %v382_v41 }
 0x122   :  { %v836_v44 = vpop.f32.mrf.mxu0 }
 0x123   :  { %v384_v47 = vpack.c.bf16 %v836_v44, %v835_v42 }
 0x124   :  { %v314_v45 = vpop.f32.mrf.mxu0 }
 0x125   :  { %v383_v46 = vpack.c.bf16 %v314_v45, %v311_v43 }
 0x127   :  { %865 = vmatprep.mubr.bf16.mxu1 %v383_v46 }
 0x128   :  { %866 = vmatmul.mubr.bf16.gmra.mxu1 %v384_v47 }
 0x1d0   :  { %v855_v48 = vpop.f32.mrf.mxu1 }
 0x1d1   :  { %v499_v51 = vadd.f32 %v855_v48, %v685_v49 }
 0x1d2   :  { %v490_v50 = vpop.f32.mrf.mxu1 }
 0x1d3   :  { %v491_v53 = vadd.f32 %v685_v49, %v490_v50  ;;  %v555_v56 = vmax.f32 %v499_v51, 0.0 }
 0x1d4   :  { %v856_v52 = vpop.f32.mrf.mxu1 }
 0x1d5   :  { %v502_v54 = vadd.f32 %v856_v52, %v685_v49  ;;  %v553_v60 = vmax.f32 %v491_v53, 0.0 }
 0x1d6   :  { %v493_v55 = vpop.f32.mrf.mxu1 }
 0x1d7   :  { %v556_v57 = vmax.f32 %v502_v54, 0.0  ;;  %v494_v58 = vadd.f32 %v685_v49, %v493_v55 }
 0x1d8   :  { %v859_v59 = vpop.f32.mrf.mxu1 }
 0x1d9   :  { %v734_v61 = vpack.c.bf16 %v556_v57, %v555_v56  ;;  %v554_v62 = vmax.f32 %v494_v58, 0.0  ;;  %v515_v1 = vadd.f32 %v859_v59, %v685_v49 }
 0x1da   :  { %v506_v63 = vpop.f32.mrf.mxu1 }
 0x1db   :  { %766 = vst [vmem:[#allocation9 + $0x8] sm:$0xff] %v734_v61   ;;  %v729_v0 = vpack.c.bf16 %v554_v62, %v553_v60  ;;  %v507_v3 = vadd.f32 %v685_v49, %v506_v63  ;;  %v559_v6 = vmax.f32 %v515_v1, 0.0 }
 0x1dc   :  { %v860_v2 = vpop.f32.mrf.mxu1 }
 0x1dd   :  { %730 = vst [vmem:[#allocation9] sm:$0xff] %v729_v0   ;;  %v518_v4 = vadd.f32 %v860_v2, %v685_v49  ;;  %v557_v10 = vmax.f32 %v507_v3, 0.0 }
 0x1de   :  { %v509_v5 = vpop.f32.mrf.mxu1 }
 0x1df   :  { %v560_v7 = vmax.f32 %v518_v4, 0.0  ;;  %v510_v8 = vadd.f32 %v685_v49, %v509_v5 }
 0x1e0   :  { %v863_v9 = vpop.f32.mrf.mxu1 }
 0x1e1   :  { %v744_v11 = vpack.c.bf16 %v560_v7, %v559_v6  ;;  %v558_v12 = vmax.f32 %v510_v8, 0.0  ;;  %v531_v15 = vadd.f32 %v863_v9, %v685_v49 }
 0x1e2   :  { %v522_v13 = vpop.f32.mrf.mxu1 }
 0x1e3   :  { %768 = vst [vmem:[#allocation9 + $0x18] sm:$0xff] %v744_v11   ;;  %v739_v14 = vpack.c.bf16 %v558_v12, %v557_v10  ;;  %v523_v17 = vadd.f32 %v685_v49, %v522_v13  ;;  %v563_v20 = vmax.f32 %v531_v15, 0.0 }
 0x1e4   :  { %v864_v16 = vpop.f32.mrf.mxu1 }
 0x1e5   :  { %767 = vst [vmem:[#allocation9 + $0x10] sm:$0xff] %v739_v14   ;;  %v534_v18 = vadd.f32 %v864_v16, %v685_v49  ;;  %v561_v24 = vmax.f32 %v523_v17, 0.0 }
 0x1e6   :  { %v525_v19 = vpop.f32.mrf.mxu1 }
 0x1e7   :  { %v564_v21 = vmax.f32 %v534_v18, 0.0  ;;  %v526_v22 = vadd.f32 %v685_v49, %v525_v19 }
 0x1e8   :  { %v867_v23 = vpop.f32.mrf.mxu1 }
 0x1e9   :  { %v754_v25 = vpack.c.bf16 %v564_v21, %v563_v20  ;;  %v562_v26 = vmax.f32 %v526_v22, 0.0  ;;  %v547_v29 = vadd.f32 %v867_v23, %v685_v49 }
 0x1ea   :  { %v538_v27 = vpop.f32.mrf.mxu1 }
 0x1eb   :  { %770 = vst [vmem:[#allocation9 + $0x28] sm:$0xff] %v754_v25   ;;  %v749_v28 = vpack.c.bf16 %v562_v26, %v561_v24  ;;  %v539_v31 = vadd.f32 %v685_v49, %v538_v27  ;;  %v567_v34 = vmax.f32 %v547_v29, 0.0 }
 0x1ec   :  { %v868_v30 = vpop.f32.mrf.mxu1 }
 0x1ed   :  { %769 = vst [vmem:[#allocation9 + $0x20] sm:$0xff] %v749_v28   ;;  %v550_v32 = vadd.f32 %v868_v30, %v685_v49  ;;  %v565_v37 = vmax.f32 %v539_v31, 0.0 }
 0x1ee   :  { %v541_v33 = vpop.f32.mrf.mxu1 }
 0x1ef   :  { %v568_v35 = vmax.f32 %v550_v32, 0.0  ;;  %v542_v36 = vadd.f32 %v685_v49, %v541_v33 }
 0x1f1   :  { %v764_v38 = vpack.c.bf16 %v568_v35, %v567_v34  ;;  %v566_v39 = vmax.f32 %v542_v36, 0.0 }
 0x1f3   :  { %772 = vst [vmem:[#allocation9 + $0x38] sm:$0xff] %v764_v38   ;;  %v759_v40 = vpack.c.bf16 %v566_v39, %v565_v37 }
 0x1f5   :  { %771 = vst [vmem:[#allocation9 + $0x30] sm:$0xff] %v759_v40  }
 0x1f6   :  { %970 = shalt.err (!%p967_p5)
}
 0x1f7   :  { %660 = dma.vmem_to_hbm [thread:$0]  %s655_s5, 1024, %s1047_s4, [#allocation5], %s987_s20, %s987_s20, %s988_s21  }
 0x1f8   :  { %983 = dma.done.wait [#allocation5], 1024  }
 0x1f9   :  { %984 = vsyncadd [#allocation5], 4294966272 }
 0x1fa   :  { %664 = vsyncpa [#allocation4], 1 }
 0x1fb   :  { %665 = vsyncpa [#allocation7], 1 }
 0x1fc   :  { %666 = vsyncpa [#allocation5], 1 }

</bundles_post_ra>
